<compile_context>
chip_gen: v6e
topology: v6e:2x2x1
jax: 0.10.0
libtpu: 0.0.40
codegen_flags: <defaults>
</compile_context>

<pallas_src>
import functools

import jax
import jax.numpy as jnp
from jax.experimental import pallas as pl
from jax.experimental.pallas import tpu as pltpu


def _round_up(n, m):
    return ((n + m - 1) // m) * m


def _make_fused_mlp_kernel(activations):
    """Kernel body: chain of y = act(x @ W_l + b_l), everything resident in VMEM."""

    def kernel(*refs):
        x_ref = refs[0]
        o_ref = refs[-1]
        params = refs[1:-1]  # interleaved (w0, b0, w1, b1, ...)
        h = x_ref[...]  # f32
        for l, act in enumerate(activations):
            w = params[2 * l][...]        # bf16 padded weight
            b = params[2 * l + 1][...]    # (1, fout_p) f32 -> broadcasts over rows
            # bf16 MXU inputs, f32 accumulate; elementwise math stays f32.
            y = jnp.dot(h.astype(w.dtype), w,
                        preferred_element_type=jnp.float32) + b
            if act == "relu":
                h = jnp.maximum(y, 0.0)
            elif act == "sigmoid":
                h = jax.nn.sigmoid(y)
            else:
                raise ValueError(f"Invalid activation {act}")
        o_ref[...] = h.astype(o_ref.dtype)

    return kernel


def fused_mlp_forward(x, padded_weights, padded_biases, *, activations, out_dim):
    """Single fused pallas_call for an MLP stack.

    x:               (B, in_dim) unpadded f32 activations.
    padded_weights:  list of bf16 weights; layer-0 K dim unpadded, all other
                     feature dims zero-padded to multiples of 128.
    padded_biases:   list of (1, fout_p) f32, zero-padded.
    activations:     tuple of "relu"/"sigmoid" per layer (static).
    out_dim:         true (unpadded) output feature dim (static).
    """
    B, in_dim = x.shape
    assert padded_weights[0].shape[0] == in_dim
    out_p = padded_weights[-1].shape[1]

    widest_p = max([in_dim] + [w.shape[1] for w in padded_weights])
    param_bytes = (sum(w.size * w.dtype.itemsize for w in padded_weights)
                   + sum(b.size * b.dtype.itemsize for b in padded_biases))

    # ---- batch tiling -------------------------------------------------------
    B8 = _round_up(B, 8)
    # VMEM budget for activations: leave headroom under v7x's 64 MiB per-TC
    # VMEM after the (single-buffered) resident params; ~4 live f32 buffers of
    # the widest padded width per grid step.
    act_budget = max((48 << 20) - param_bytes, 4 << 20)
    max_tile_by_vmem = max(8, (act_budget // (4 * 4 * widest_p)) // 8 * 8)
    max_tile = min(512, max_tile_by_vmem)

    n_steps = pl.cdiv(B8, max_tile)
    if B8 >= 16:
        # >= 2 grid steps so the "parallel" axis can be split across the two
        # TensorCores on v7x.
        n_steps = max(n_steps, 2)
    batch_tile = _round_up(pl.cdiv(B8, n_steps), 8)
    Bp = n_steps * batch_tile

    # Only the batch remainder is padded; the lane (feature) axis of x is left
    # at its true size (layer-0 weight K dim is unpadded, full-array block).
    if Bp != B:
        x = jnp.pad(x, ((0, Bp - B), (0, 0)))

    kernel = _make_fused_mlp_kernel(tuple(activations))

    in_specs = [pl.BlockSpec((batch_tile, in_dim), lambda i: (i, 0))]
    args = [x]
    resident = pl.Buffered(1)  # constant index_map -> no double-buffer waste
    for w, b in zip(padded_weights, padded_biases):
        in_specs.append(pl.BlockSpec(w.shape, lambda i: (0, 0),
                                     pipeline_mode=resident))
        in_specs.append(pl.BlockSpec(b.shape, lambda i: (0, 0),
                                     pipeline_mode=resident))
        args.append(w)
        args.append(b)

    # Explicit scoped-VMEM limit: resident params (x1 buffer) + double-buffered
    # I/O tiles + live f32 activations + slack.
    io_bytes = 2 * batch_tile * (in_dim + out_p) * 4
    act_bytes = 4 * batch_tile * widest_p * 4
    vmem_limit = int(min(max(param_bytes + io_bytes + act_bytes + (2 << 20),
                             16 << 20),
                         100 << 20))

    flops = 2 * Bp * sum(w.shape[0] * w.shape[1] for w in padded_weights)
    transcendentals = Bp * out_p if activations[-1] == "sigmoid" else 0
    bytes_accessed = param_bytes + Bp * (in_dim + out_p) * 4

    y_padded = pl.pallas_call(
        kernel,
        out_shape=jax.ShapeDtypeStruct((Bp, out_p), x.dtype),
        grid=(n_steps,),
        in_specs=in_specs,
        out_specs=pl.BlockSpec((batch_tile, out_p), lambda i: (i, 0)),
        compiler_params=pltpu.CompilerParams(
            dimension_semantics=("parallel",),
            vmem_limit_bytes=vmem_limit,
        ),
        cost_estimate=pl.CostEstimate(
            flops=flops,
            transcendentals=transcendentals,
            bytes_accessed=bytes_accessed,
        ),
    )(*args)

    # Padded output lanes of the sigmoid layer hold sigmoid(0)=0.5 and padded
    # batch rows are garbage -> slice both off before exposing.
    return y_padded[:B, :out_dim]


def _pad_params(params, *, lane=128, weight_dtype=jnp.bfloat16):
    """Zero-pad (w, b) pairs for a layer CHAIN.

    The first layer's K (fan-in) dim is left unpadded (full-array weight blocks
    are exempt from the 128-lane rule), so the input never needs lane padding.
    All other feature dims are padded to multiples of `lane`; zero padding keeps
    the math exact (padded rows/cols contribute 0, ReLU keeps them 0).
    Weights are stored in bf16 (MXU-native); biases stay f32.
    """
    pw, pb = [], []
    for l, (w, b) in enumerate(params):
        fin, fout = w.shape
        fin_p = fin if l == 0 else _round_up(fin, lane)
        fout_p = _round_up(fout, lane)
        wp = (jnp.zeros((fin_p, fout_p), weight_dtype)
              .at[:fin, :fout].set(w.astype(weight_dtype)))
        bp = (jnp.zeros((1, fout_p), jnp.float32)
              .at[0, :fout].set(b.astype(jnp.float32)))
        pw.append(wp)
        pb.append(bp)
    return pw, pb


class AutoencoderPallas:
    """JAX/Pallas re-implementation of the pyneural Autoencoder forward pass."""

    def __init__(self, layers, h_activation="relu", o_activation="sigmoid", key=None):
        assert h_activation == "relu" and o_activation == "sigmoid"
        self.layers = list(layers)
        self.h_activation = h_activation
        self.o_activation = o_activation

        if key is None:
            key = jax.random.PRNGKey(0)

        rev = list(reversed(layers))
        self.enc_params = []
        self.dec_params = []
        # Deterministic init (uniform with torch-Linear-style bound 1/sqrt(fan_in)).
        for i in range(len(layers) - 1):
            key, k1, k2 = jax.random.split(key, 3)
            fan_in = layers[i]
            bound = 1.0 / (fan_in ** 0.5)
            w = jax.random.uniform(k1, (layers[i], layers[i + 1]),
                                   minval=-bound, maxval=bound, dtype=jnp.float32)
            bb = jax.random.uniform(k2, (layers[i + 1],),
                                    minval=-bound, maxval=bound, dtype=jnp.float32)
            self.enc_params.append((w, bb))
        for i in range(len(layers) - 1):
            key, k1, k2 = jax.random.split(key, 3)
            fan_in = rev[i]
            bound = 1.0 / (fan_in ** 0.5)
            w = jax.random.uniform(k1, (rev[i], rev[i + 1]),
                                   minval=-bound, maxval=bound, dtype=jnp.float32)
            bb = jax.random.uniform(k2, (rev[i + 1],),
                                    minval=-bound, maxval=bound, dtype=jnp.float32)
            self.dec_params.append((w, bb))

        # Pad per CHAIN so that every layer's padded fan-in matches the previous
        # layer's padded fan-out (only the chain's first K dim stays unpadded).
        self._enc_pw, self._enc_pb = _pad_params(self.enc_params)
        self._dec_pw, self._dec_pb = _pad_params(self.dec_params)
        self._all_pw, self._all_pb = _pad_params(self.enc_params + self.dec_params)

        n_enc = len(self.enc_params)
        n_dec = len(self.dec_params)
        enc_acts = ("relu",) * n_enc
        dec_acts = ("relu",) * (n_dec - 1) + ("sigmoid",)

        # Jit once per function (static activations / out_dim baked via partial).
        self._encode_fn = jax.jit(functools.partial(
            fused_mlp_forward, activations=enc_acts, out_dim=layers[-1]))
        self._decode_fn = jax.jit(functools.partial(
            fused_mlp_forward, activations=dec_acts, out_dim=layers[0]))
        self._forward_fn = jax.jit(functools.partial(
            fused_mlp_forward, activations=enc_acts + dec_acts, out_dim=layers[0]))

    def encode(self, x):
        return self._encode_fn(x, self._enc_pw, self._enc_pb)

    def decode(self, x):
        return self._decode_fn(x, self._dec_pw, self._dec_pb)

    def __call__(self, x):
        # Fully fused: encoder + decoder in one kernel, one dispatch.
        return self._forward_fn(x, self._all_pw, self._all_pb)


def reference_forward(model, x):
    """Pure-JAX reference (same bf16-input / f32-accumulate dot as the kernel)."""
    def dot_bf16(a, w):
        return jnp.dot(a.astype(jnp.bfloat16), w.astype(jnp.bfloat16),
                       preferred_element_type=jnp.float32)

    h = x
    for (w, b) in model.enc_params:
        h = jnp.maximum(dot_bf16(h, w) + b, 0.0)
    n = len(model.dec_params)
    for i, (w, b) in enumerate(model.dec_params):
        y = dot_bf16(h, w) + b
        h = jnp.maximum(y, 0.0) if i != n - 1 else jax.nn.sigmoid(y)
    return h


if __name__ == "__main__":
    key = jax.random.PRNGKey(0)
    k_in, k_in2, k_model = jax.random.split(key, 3)

    # Small autoencoder: 64 -> 32 -> 16 -> 32 -> 64
    layers = [64, 32, 16]
    model = AutoencoderPallas(layers, key=k_model)

    # Case 1: batch=6 (not a multiple of 8) -> single grid step, row padding.
    batch = 6
    x = jax.random.uniform(k_in, (batch, layers[0]), dtype=jnp.float32)
    out = jax.block_until_ready(model(x))
    ref = reference_forward(model, x)
    assert out.shape == (batch, layers[0]), out.shape
    assert jnp.allclose(out, ref, atol=2e-2, rtol=2e-2)

    # encode/decode chaining matches fused forward.
    out2 = jax.block_until_ready(model.decode(model.encode(x)))
    assert jnp.allclose(out2, ref, atol=2e-2, rtol=2e-2)

    # Case 2: awkward batch=130 -> multi-step "parallel" grid with minimal row
    # padding (144 rows, not 256).
    batch2 = 130
    x2 = jax.random.uniform(k_in2, (batch2, layers[0]), dtype=jnp.float32)
    out_big = jax.block_until_ready(model(x2))
    ref_big = reference_forward(model, x2)
    assert out_big.shape == (batch2, layers[0]), out_big.shape
    assert jnp.allclose(out_big, ref_big, atol=2e-2, rtol=2e-2)

    print("KERNEL_OK")
</pallas_src>

<mosaic_0001>
module attributes {stable_mosaic.version = 11 : i64} {
  func.func @kernel(%arg0: i32, %arg1: memref<8x64xf32, #tpu.memory_space<vmem>>, %arg2: memref<64x128xbf16, #tpu.memory_space<vmem>>, %arg3: memref<1x128xf32, #tpu.memory_space<vmem>>, %arg4: memref<128x128xbf16, #tpu.memory_space<vmem>>, %arg5: memref<1x128xf32, #tpu.memory_space<vmem>>, %arg6: memref<128x128xbf16, #tpu.memory_space<vmem>>, %arg7: memref<1x128xf32, #tpu.memory_space<vmem>>, %arg8: memref<128x128xbf16, #tpu.memory_space<vmem>>, %arg9: memref<1x128xf32, #tpu.memory_space<vmem>>, %arg10: memref<8x128xf32, #tpu.memory_space<vmem>>) attributes {dimension_semantics = [#tpu.dimension_semantics<parallel>], iteration_bounds = array<i64: 1>, scalar_prefetch = 0 : i64, scratch_operands = 0 : i64, tpu.core_type = #tpu.core_type<tc>, window_params = [{transform_indices = @transform_0, window_bounds = array<i64: 8, 64>}, {pipeline_mode = #tpu.pipeline_mode<synchronous>, transform_indices = @transform_1, window_bounds = array<i64: 64, 128>}, {pipeline_mode = #tpu.pipeline_mode<synchronous>, transform_indices = @transform_2, window_bounds = array<i64: 1, 128>}, {pipeline_mode = #tpu.pipeline_mode<synchronous>, transform_indices = @transform_3, window_bounds = array<i64: 128, 128>}, {pipeline_mode = #tpu.pipeline_mode<synchronous>, transform_indices = @transform_4, window_bounds = array<i64: 1, 128>}, {pipeline_mode = #tpu.pipeline_mode<synchronous>, transform_indices = @transform_5, window_bounds = array<i64: 128, 128>}, {pipeline_mode = #tpu.pipeline_mode<synchronous>, transform_indices = @transform_6, window_bounds = array<i64: 1, 128>}, {pipeline_mode = #tpu.pipeline_mode<synchronous>, transform_indices = @transform_7, window_bounds = array<i64: 128, 128>}, {pipeline_mode = #tpu.pipeline_mode<synchronous>, transform_indices = @transform_8, window_bounds = array<i64: 1, 128>}, {transform_indices = @transform_9, window_bounds = array<i64: 8, 128>}]} {
    %c0 = arith.constant 0 : index
    %c0_0 = arith.constant 0 : index
    %0 = vector.load %arg1[%c0, %c0_0] : memref<8x64xf32, #tpu.memory_space<vmem>>, vector<8x64xf32>
    %c0_1 = arith.constant 0 : index
    %c0_2 = arith.constant 0 : index
    %1 = vector.load %arg2[%c0_1, %c0_2] : memref<64x128xbf16, #tpu.memory_space<vmem>>, vector<64x128xbf16>
    %c0_3 = arith.constant 0 : index
    %c0_4 = arith.constant 0 : index
    %2 = vector.load %arg3[%c0_3, %c0_4] : memref<1x128xf32, #tpu.memory_space<vmem>>, vector<1x128xf32>
    %3 = arith.truncf %0 : vector<8x64xf32> to vector<8x64xbf16>
    %cst = arith.constant dense<0.000000e+00> : vector<8x128xf32>
    %4 = tpu.matmul %3, %1, %cst {dimension_numbers = #tpu.dot_dimension_numbers<[1], [0], [0], [1], [0, 0, 1, 1], [], []>} : vector<8x64xbf16>, vector<64x128xbf16>, vector<8x128xf32> -> vector<8x128xf32>
    %5 = vector.broadcast %2 : vector<1x128xf32> to vector<8x128xf32>
    %6 = arith.addf %4, %5 : vector<8x128xf32>
    %cst_5 = arith.constant 0.000000e+00 : f32
    %7 = vector.broadcast %cst_5 : f32 to vector<8x128xf32>
    %8 = arith.maximumf %6, %7 : vector<8x128xf32>
    %c0_6 = arith.constant 0 : index
    %c0_7 = arith.constant 0 : index
    %9 = vector.load %arg4[%c0_6, %c0_7] : memref<128x128xbf16, #tpu.memory_space<vmem>>, vector<128x128xbf16>
    %c0_8 = arith.constant 0 : index
    %c0_9 = arith.constant 0 : index
    %10 = vector.load %arg5[%c0_8, %c0_9] : memref<1x128xf32, #tpu.memory_space<vmem>>, vector<1x128xf32>
    %11 = arith.truncf %8 : vector<8x128xf32> to vector<8x128xbf16>
    %cst_10 = arith.constant dense<0.000000e+00> : vector<8x128xf32>
    %12 = tpu.matmul %11, %9, %cst_10 {dimension_numbers = #tpu.dot_dimension_numbers<[1], [0], [0], [1], [0, 0, 1, 1], [], []>} : vector<8x128xbf16>, vector<128x128xbf16>, vector<8x128xf32> -> vector<8x128xf32>
    %13 = vector.broadcast %10 : vector<1x128xf32> to vector<8x128xf32>
    %14 = arith.addf %12, %13 : vector<8x128xf32>
    %cst_11 = arith.constant 0.000000e+00 : f32
    %15 = vector.broadcast %cst_11 : f32 to vector<8x128xf32>
    %16 = arith.maximumf %14, %15 : vector<8x128xf32>
    %c0_12 = arith.constant 0 : index
    %c0_13 = arith.constant 0 : index
    %17 = vector.load %arg6[%c0_12, %c0_13] : memref<128x128xbf16, #tpu.memory_space<vmem>>, vector<128x128xbf16>
    %c0_14 = arith.constant 0 : index
    %c0_15 = arith.constant 0 : index
    %18 = vector.load %arg7[%c0_14, %c0_15] : memref<1x128xf32, #tpu.memory_space<vmem>>, vector<1x128xf32>
    %19 = arith.truncf %16 : vector<8x128xf32> to vector<8x128xbf16>
    %cst_16 = arith.constant dense<0.000000e+00> : vector<8x128xf32>
    %20 = tpu.matmul %19, %17, %cst_16 {dimension_numbers = #tpu.dot_dimension_numbers<[1], [0], [0], [1], [0, 0, 1, 1], [], []>} : vector<8x128xbf16>, vector<128x128xbf16>, vector<8x128xf32> -> vector<8x128xf32>
    %21 = vector.broadcast %18 : vector<1x128xf32> to vector<8x128xf32>
    %22 = arith.addf %20, %21 : vector<8x128xf32>
    %cst_17 = arith.constant 0.000000e+00 : f32
    %23 = vector.broadcast %cst_17 : f32 to vector<8x128xf32>
    %24 = arith.maximumf %22, %23 : vector<8x128xf32>
    %c0_18 = arith.constant 0 : index
    %c0_19 = arith.constant 0 : index
    %25 = vector.load %arg8[%c0_18, %c0_19] : memref<128x128xbf16, #tpu.memory_space<vmem>>, vector<128x128xbf16>
    %c0_20 = arith.constant 0 : index
    %c0_21 = arith.constant 0 : index
    %26 = vector.load %arg9[%c0_20, %c0_21] : memref<1x128xf32, #tpu.memory_space<vmem>>, vector<1x128xf32>
    %27 = arith.truncf %24 : vector<8x128xf32> to vector<8x128xbf16>
    %cst_22 = arith.constant dense<0.000000e+00> : vector<8x128xf32>
    %28 = tpu.matmul %27, %25, %cst_22 {dimension_numbers = #tpu.dot_dimension_numbers<[1], [0], [0], [1], [0, 0, 1, 1], [], []>} : vector<8x128xbf16>, vector<128x128xbf16>, vector<8x128xf32> -> vector<8x128xf32>
    %29 = vector.broadcast %26 : vector<1x128xf32> to vector<8x128xf32>
    %30 = arith.addf %28, %29 : vector<8x128xf32>
    %31 = arith.negf %30 : vector<8x128xf32>
    %32 = math.exp %31 : vector<8x128xf32>
    %cst_23 = arith.constant 1.000000e+00 : f32
    %33 = vector.broadcast %cst_23 : f32 to vector<8x128xf32>
    %34 = arith.addf %33, %32 : vector<8x128xf32>
    %35 = arith.divf %33, %34 : vector<8x128xf32>
    %c0_24 = arith.constant 0 : index
    %c0_25 = arith.constant 0 : index
    %36 = vector.load %arg10[%c0_24, %c0_25] : memref<8x128xf32, #tpu.memory_space<vmem>>, vector<8x128xf32>
    tpu.vector_store %arg10[%c0_24, %c0_25], %35 {strides = array<i32>} : memref<8x128xf32, #tpu.memory_space<vmem>>, vector<8x128xf32>,
    return
  }
  func.func @transform_0(%arg0: i32) -> (i32, i32) {
    %c0_i32 = arith.constant 0 : i32
    %c0_i32_0 = arith.constant 0 : i32
    return %arg0, %c0_i32 : i32, i32
  }
  func.func @transform_1(%arg0: i32) -> (i32, i32) {
    %c0_i32 = arith.constant 0 : i32
    %c0_i32_0 = arith.constant 0 : i32
    %c0_i32_1 = arith.constant 0 : i32
    return %c0_i32, %c0_i32_0 : i32, i32
  }
  func.func @transform_2(%arg0: i32) -> (i32, i32) {
    %c0_i32 = arith.constant 0 : i32
    %c0_i32_0 = arith.constant 0 : i32
    %c0_i32_1 = arith.constant 0 : i32
    return %c0_i32, %c0_i32_0 : i32, i32
  }
  func.func @transform_3(%arg0: i32) -> (i32, i32) {
    %c0_i32 = arith.constant 0 : i32
    %c0_i32_0 = arith.constant 0 : i32
    %c0_i32_1 = arith.constant 0 : i32
    return %c0_i32, %c0_i32_0 : i32, i32
  }
  func.func @transform_4(%arg0: i32) -> (i32, i32) {
    %c0_i32 = arith.constant 0 : i32
    %c0_i32_0 = arith.constant 0 : i32
    %c0_i32_1 = arith.constant 0 : i32
    return %c0_i32, %c0_i32_0 : i32, i32
  }
  func.func @transform_5(%arg0: i32) -> (i32, i32) {
    %c0_i32 = arith.constant 0 : i32
    %c0_i32_0 = arith.constant 0 : i32
    %c0_i32_1 = arith.constant 0 : i32
    return %c0_i32, %c0_i32_0 : i32, i32
  }
  func.func @transform_6(%arg0: i32) -> (i32, i32) {
    %c0_i32 = arith.constant 0 : i32
    %c0_i32_0 = arith.constant 0 : i32
    %c0_i32_1 = arith.constant 0 : i32
    return %c0_i32, %c0_i32_0 : i32, i32
  }
  func.func @transform_7(%arg0: i32) -> (i32, i32) {
    %c0_i32 = arith.constant 0 : i32
    %c0_i32_0 = arith.constant 0 : i32
    %c0_i32_1 = arith.constant 0 : i32
    return %c0_i32, %c0_i32_0 : i32, i32
  }
  func.func @transform_8(%arg0: i32) -> (i32, i32) {
    %c0_i32 = arith.constant 0 : i32
    %c0_i32_0 = arith.constant 0 : i32
    %c0_i32_1 = arith.constant 0 : i32
    return %c0_i32, %c0_i32_0 : i32, i32
  }
  func.func @transform_9(%arg0: i32) -> (i32, i32) {
    %c0_i32 = arith.constant 0 : i32
    %c0_i32_0 = arith.constant 0 : i32
    return %arg0, %c0_i32 : i32, i32
  }
}

</mosaic_0001>

<bundles_post_ra>
// kernel: fused_mlp_forward.1
= control target key start
LH: loop header
LB: loop body
LE: loop exit
PB: predicated region body
PF: predicated region fallthrough
CT: control target
= control target key end

     0   :  { %14 = vsyncpa [#allocation3], 0  ;;  %s961_s0 = inlined_call_operand.vmem [shape: f32[8,64], index: 0, kind: input, shape index: {}]   ;;  %s962_s1 = inlined_call_operand.hbm [shape: bf16[64,128], index: 1, kind: input, shape index: {}]   ;;  %s963_s2 = inlined_call_operand.vmem [shape: f32[1,128], index: 2, kind: input, shape index: {}]   ;;  %s964_s3 = inlined_call_operand.hbm [shape: bf16[128,128], index: 3, kind: input, shape index: {}]   ;;  %s965_s4 = inlined_call_operand.vmem [shape: f32[1,128], index: 4, kind: input, shape index: {}]   ;;  %s966_s5 = inlined_call_operand.hbm [shape: bf16[128,128], index: 5, kind: input, shape index: {}]   ;;  %s967_s6 = inlined_call_operand.vmem [shape: f32[1,128], index: 6, kind: input, shape index: {}]   ;;  %s968_s7 = inlined_call_operand.hbm [shape: bf16[128,128], index: 7, kind: input, shape index: {}]   ;;  %s969_s8 = inlined_call_operand.vmem [shape: f32[1,128], index: 8, kind: input, shape index: {}]   ;;  %s970_s9 = inlined_call_operand.hbm [shape: f32[8,128], index: 9, kind: output, shape index: {}]  }
   0x1   :  { %15 = vsyncpa [#allocation6], 0 }
   0x2   :  { %16 = vsyncpa [#allocation9], 0 }
   0x3   :  { %17 = vsyncpa [#allocation4], 0  ;;  %s824_s30 = smov [#allocation5]   ;;  %s825_s11 = smov [#allocation2]  }
   0x4   :  { %s39_s10 = sshll.u32 %s824_s30, 4  ;;  %s25_s12 = sshll.u32 %s825_s11, 4  ;;  %s40_s10 = int_to_ptr.vmem [resolvable:$true] %s39_s10  ;;  %s26_s12 = int_to_ptr.vmem [resolvable:$true] %s25_s12 }
   0x5   :  { %s724_s13 = scalar_lea.vmem %s40_s10, 1024  ;;  %p729_p1 = scmp.lt.s32.totalorder %s40_s10, %s40_s10 }
   0x6   :  { %p725_p0 = scmp.ne.s32.totalorder %s40_s10, %s724_s13  ;;  %p730_p2 = scmp.lt.s32.totalorder %s724_s13, %s724_s13 }
   0x8   :  { %p731_p3 = por %p730_p2, %p729_p1 }
   0xa   :  { %p732_p4 = pnand %p731_p3, %p725_p0 }
   0xc   :  { %735 = shalt.err (!%p732_p4)
}
   0xd   :  { %s826_s14 = smov 64   ;;  %s827_s15 = smov 4  }
   0xe   :  { %45 = dma.hbm_to_vmem [thread:$0]  %s964_s3, 1024, %s40_s10, [#allocation6], %s826_s14, %s826_s14, %s827_s15  }
   0xf   :  { %s744_s18 = scalar_lea.vmem %s26_s12, 512  ;;  %p749_p6 = scmp.lt.s32.totalorder %s26_s12, %s26_s12 }
  0x10   :  { %p745_p5 = scmp.ne.s32.totalorder %s26_s12, %s744_s18  ;;  %p750_p7 = scmp.lt.s32.totalorder %s744_s18, %s744_s18 }
  0x12   :  { %p751_p8 = por %p750_p7, %p749_p6 }
  0x14   :  { %p752_p9 = pnand %p751_p8, %p745_p5 }
  0x16   :  { %755 = shalt.err (!%p752_p9)
}
  0x17   :  { %31 = dma.hbm_to_vmem [thread:$0]  %s962_s1, 512, %s26_s12, [#allocation3], %s826_s14, %s826_s14, %s827_s15  }
  0x18   :  { %s828_s21 = smov [#allocation7]   ;;  %s829_s23 = smov [#allocation8]  }
  0x19   :  { %s53_s22 = sshll.u32 %s828_s21, 4  ;;  %s67_s24 = sshll.u32 %s829_s23, 4  ;;  %s54_s22 = int_to_ptr.vmem [resolvable:$true] %s53_s22  ;;  %s68_s24 = int_to_ptr.vmem [resolvable:$true] %s67_s24 }
  0x1a   :  { %s764_s3 = scalar_lea.vmem %s54_s22, 1024  ;;  %p769_p11 = scmp.lt.s32.totalorder %s54_s22, %s54_s22 }
  0x1b   :  { %p765_p10 = scmp.ne.s32.totalorder %s54_s22, %s764_s3  ;;  %p770_p12 = scmp.lt.s32.totalorder %s764_s3, %s764_s3 }
  0x1d   :  { %p771_p13 = por %p770_p12, %p769_p11 }
  0x1f   :  { %p772_p0 = pnand %p771_p13, %p765_p10 }
  0x21   :  { %775 = shalt.err (!%p772_p0)
}
  0x22   :  { %59 = dma.hbm_to_vmem [thread:$0]  %s966_s5, 1024, %s54_s22, [#allocation6], %s826_s14, %s826_s14, %s827_s15  }
  0x23   :  { %s784_s1 = scalar_lea.vmem %s68_s24, 1024  ;;  %p789_p2 = scmp.lt.s32.totalorder %s68_s24, %s68_s24 }
  0x24   :  { %p785_p1 = scmp.ne.s32.totalorder %s68_s24, %s784_s1  ;;  %p790_p3 = scmp.lt.s32.totalorder %s784_s1, %s784_s1 }
  0x26   :  { %p791_p4 = por %p790_p3, %p789_p2 }
  0x28   :  { %p792_p5 = pnand %p791_p4, %p785_p1 }
  0x2a   :  { %795 = shalt.err (!%p792_p5)
}
  0x2b   :  { %73 = dma.hbm_to_vmem [thread:$0]  %s968_s7, 1024, %s68_s24, [#allocation9], %s826_s14, %s826_s14, %s827_s15  }
  0x2c   :  { %816 = dma.done.wait [#allocation3], 512  }
  0x2d   :  { %817 = vsyncadd [#allocation3], 4294966784 }
  0x2e   :  { %818 = dma.done.wait [#allocation6], 2048  }
  0x2f   :  { %819 = vsyncadd [#allocation6], 4294965248 }
  0x30   :  { %820 = dma.done.wait [#allocation9], 1024  }
  0x31   :  { %821 = vsyncadd [#allocation9], 4294966272  ;;  %v830_v0 = vmov 0.0   ;;  %vm831_vm0 = vmmov 0   ;;  %v684_v1 = vld [vmem:[#allocation2 + $0x18] sm:$0xff]   ;;  %v685_v2 = vld [vmem:[#allocation2 + $0x10] sm:$0xff]  }
  0x32   :  { %603 = vmatprep.subr.bf16.mxu0 %v830_v0  ;;  %611 = vmatprep.mubr.msk.bf16.mxu0 %vm831_vm0, %v830_v0  ;;  %v688_v3 = vld [vmem:[#allocation5 + $0x38] sm:$0xff]   ;;  %v686_v4 = vld [vmem:[#allocation2 + $0x8] sm:$0xff]   ;;  %v689_v5 = vld [vmem:[#allocation5 + $0x30] sm:$0xff]   ;;  %vm130_vm1 = vcmask 523264  }
  0x33   :  { %615 = vmatprep.subr.bf16.mxu1 %v830_v0  ;;  %631 = vmatprep.mubr.msk.bf16.mxu1 %vm831_vm0, %v830_v0  ;;  %v687_v6 = vld [vmem:[#allocation2] sm:$0xff]   ;;  %v690_v8 = vld [vmem:[#allocation5 + $0x28] sm:$0xff]   ;;  %v692_v11 = vld [vmem:[#allocation5 + $0x18] sm:$0xff]  }
  0x34   :  { %604 = vmatpush3.bf16.msra.mxu0 %v684_v1  ;;  %616 = vmatpush3.bf16.msra.mxu1 %v688_v3  ;;  %v89_v7 = vld [vmem:[%s961_s0] sm:$0xff]  ;;  %v693_v12 = vld [vmem:[#allocation5 + $0x10] sm:$0xff]   ;;  %v694_v13 = vld [vmem:[#allocation5 + $0x8] sm:$0xff]  }
  0x35   :  { %605 = vmatprep.subr.bf16.mxu0 %v830_v0  ;;  %617 = vmatprep.subr.bf16.mxu1 %v830_v0  ;;  %v99_v9 = vpack.c.bf16 %v89_v7, %v89_v7  ;;  %v691_v10 = vld [vmem:[#allocation5 + $0x20] sm:$0xff]   ;;  %v696_v15 = vld [vmem:[#allocation7 + $0x38] sm:$0xff]   ;;  %v697_v16 = vld [vmem:[#allocation7 + $0x30] sm:$0xff]  }
  0x36   :  { %v695_v14 = vld [vmem:[#allocation5] sm:$0xff]   ;;  %v698_v17 = vld [vmem:[#allocation7 + $0x28] sm:$0xff]   ;;  %v700_v19 = vld [vmem:[#allocation7 + $0x18] sm:$0xff]  }
  0x37   :  { %v699_v18 = vld [vmem:[#allocation7 + $0x20] sm:$0xff]   ;;  %v701_v20 = vld [vmem:[#allocation7 + $0x10] sm:$0xff]   ;;  %v702_v29 = vld [vmem:[#allocation7 + $0x8] sm:$0xff]  }
  0x38   :  { %606 = vmatpush3.bf16.msra.mxu0 %v685_v2  ;;  %618 = vmatpush3.bf16.msra.mxu1 %v689_v5  ;;  %v537_v21 = vld [vmem:[%s963_s2] ss:$0 sm:$0xff]  ;;  %v704_v31 = vld [vmem:[#allocation8 + $0x38] sm:$0xff]   ;;  %v705_v32 = vld [vmem:[#allocation8 + $0x30] sm:$0xff]  }
  0x39   :  { %607 = vmatprep.subr.bf16.mxu0 %v830_v0  ;;  %619 = vmatprep.subr.bf16.mxu1 %v830_v0  ;;  %v703_v30 = vld [vmem:[#allocation7] sm:$0xff]   ;;  %v706_v33 = vld [vmem:[#allocation8 + $0x28] sm:$0xff]   ;;  %v708_v35 = vld [vmem:[#allocation8 + $0x18] sm:$0xff]  }
  0x3a   :  { %v707_v34 = vld [vmem:[#allocation8 + $0x20] sm:$0xff]   ;;  %v709_v36 = vld [vmem:[#allocation8 + $0x10] sm:$0xff]   ;;  %v710_v45 = vld [vmem:[#allocation8 + $0x8] sm:$0xff]  }
  0x3b   :  { %v543_v37 = vld [vmem:[%s965_s4] ss:$0 sm:$0xff] }
  0x3c   :  { %608 = vmatpush3.bf16.msra.mxu0 %v686_v4  ;;  %620 = vmatpush3.bf16.msra.mxu1 %v690_v8  ;;  %v711_v46 = vld [vmem:[#allocation8] sm:$0xff]  }
  0x3d   :  { %609 = vmatprep.subr.bf16.mxu0 %v830_v0  ;;  %621 = vmatprep.subr.bf16.mxu1 %v830_v0  ;;  %v552_v47 = vld [vmem:[%s967_s6] ss:$0 sm:$0xff]  ;;  %s832_s6 = smov [#allocation10]  }
  0x3e   :  { %v561_v55 = vld [vmem:[%s969_s8] ss:$0 sm:$0xff]  ;;  %s526_s13 = sshll.u32 %s832_s6, 4  ;;  %s527_s13 = int_to_ptr.vmem [resolvable:$true] %s526_s13 }
  0x3f   :  { %s796_s14 = scalar_lea.vmem %s527_s13, 128  ;;  %p801_p7 = scmp.lt.s32.totalorder %s527_s13, %s527_s13 }
  0x40   :  { %610 = vmatpush3.bf16.msra.mxu0 %v687_v6  ;;  %622 = vmatpush3.bf16.msra.mxu1 %v691_v10  ;;  %p797_p6 = scmp.ne.s32.totalorder %s527_s13, %s796_s14  ;;  %p802_p8 = scmp.lt.s32.totalorder %s796_s14, %s796_s14 }
  0x41   :  { %635 = vmatprep.subr.bf16.mxu0 %v830_v0  ;;  %623 = vmatprep.subr.bf16.mxu1 %v830_v0 }
  0x42   :  { %p803_p9 = por %p802_p8, %p801_p7 }
  0x43   :  { %612 = vmatmul.mubr.msk.bf16.vlgmr.msra.gmra.mxu0 %vm130_vm1, %v99_v9 }
  0x44   :  { %651 = vmatprep.mubr.msk.bf16.mxu0 %vm831_vm0, %v830_v0  ;;  %624 = vmatpush3.bf16.msra.mxu1 %v692_v11  ;;  %p804_p10 = pnand %p803_p9, %p797_p6 }
  0x45   :  { %625 = vmatprep.subr.bf16.mxu1 %v830_v0  ;;  %636 = vmatpush3.bf16.msra.mxu0 %v696_v15 }
  0x46   :  { %637 = vmatprep.subr.bf16.mxu0 %v830_v0 }
  0x48   :  { %626 = vmatpush3.bf16.msra.mxu1 %v693_v12 }
  0x49   :  { %627 = vmatprep.subr.bf16.mxu1 %v830_v0  ;;  %638 = vmatpush3.bf16.msra.mxu0 %v697_v16 }
  0x4a   :  { %639 = vmatprep.subr.bf16.mxu0 %v830_v0 }
  0x4c   :  { %628 = vmatpush3.bf16.msra.mxu1 %v694_v13 }
  0x4d   :  { %629 = vmatprep.subr.bf16.mxu1 %v830_v0  ;;  %640 = vmatpush3.bf16.msra.mxu0 %v698_v17 }
  0x4e   :  { %641 = vmatprep.subr.bf16.mxu0 %v830_v0 }
  0x50   :  { %630 = vmatpush3.bf16.msra.mxu1 %v695_v14 }
  0x51   :  { %655 = vmatprep.subr.bf16.mxu1 %v830_v0  ;;  %642 = vmatpush3.bf16.msra.mxu0 %v699_v18 }
  0x52   :  { %643 = vmatprep.subr.bf16.mxu0 %v830_v0 }
  0x55   :  { %644 = vmatpush3.bf16.msra.mxu0 %v700_v19 }
  0x56   :  { %645 = vmatprep.subr.bf16.mxu0 %v830_v0 }
  0x59   :  { %646 = vmatpush3.bf16.msra.mxu0 %v701_v20 }
  0x5a   :  { %647 = vmatprep.subr.bf16.mxu0 %v830_v0 }
  0x5d   :  { %648 = vmatpush3.bf16.msra.mxu0 %v702_v29 }
  0x5e   :  { %649 = vmatprep.subr.bf16.mxu0 %v830_v0 }
  0x61   :  { %650 = vmatpush3.bf16.msra.mxu0 %v703_v30 }
 0x103   :  { %v168_v22 = vpop.f32.mrf.mxu0 }
 0x104   :  { %v169_v23 = vadd.f32 %v537_v21, %v168_v22 }
 0x105   :  { %v613_v24 = vpop.f32.mrf.mxu0 }
 0x106   :  { %v174_v25 = vmax.f32 %v169_v23, 0.0 }
 0x107   :  { %v171_v26 = vpop.f32.mrf.mxu0 }
 0x108   :  { %v192_v27 = vpack.c.bf16 %v174_v25, %v174_v25 }
 0x109   :  { %v614_v28 = vpop.f32.mrf.mxu0 }
 0x10a   :  { %632 = vmatmul.mubr.bf16.vlgmr.msra.gmra.mxu1 %v192_v27 }
 0x10b   :  { %671 = vmatprep.mubr.msk.bf16.mxu1 %vm831_vm0, %v830_v0  ;;  %656 = vmatpush3.bf16.msra.mxu1 %v704_v31 }
 0x10c   :  { %657 = vmatprep.subr.bf16.mxu1 %v830_v0 }
 0x10f   :  { %658 = vmatpush3.bf16.msra.mxu1 %v705_v32 }
 0x110   :  { %659 = vmatprep.subr.bf16.mxu1 %v830_v0 }
 0x113   :  { %660 = vmatpush3.bf16.msra.mxu1 %v706_v33 }
 0x114   :  { %661 = vmatprep.subr.bf16.mxu1 %v830_v0 }
 0x117   :  { %662 = vmatpush3.bf16.msra.mxu1 %v707_v34 }
 0x118   :  { %663 = vmatprep.subr.bf16.mxu1 %v830_v0 }
 0x11b   :  { %664 = vmatpush3.bf16.msra.mxu1 %v708_v35 }
 0x11c   :  { %665 = vmatprep.subr.bf16.mxu1 %v830_v0 }
 0x11f   :  { %666 = vmatpush3.bf16.msra.mxu1 %v709_v36 }
 0x120   :  { %667 = vmatprep.subr.bf16.mxu1 %v830_v0 }
 0x123   :  { %668 = vmatpush3.bf16.msra.mxu1 %v710_v45 }
 0x124   :  { %669 = vmatprep.subr.bf16.mxu1 %v830_v0 }
 0x127   :  { %670 = vmatpush3.bf16.msra.mxu1 %v711_v46 }
 0x1ca   :  { %v281_v38 = vpop.f32.mrf.mxu1 }
 0x1cb   :  { %v282_v39 = vadd.f32 %v543_v37, %v281_v38 }
 0x1cc   :  { %v633_v40 = vpop.f32.mrf.mxu1 }
 0x1cd   :  { %v287_v41 = vmax.f32 %v282_v39, 0.0 }
 0x1ce   :  { %v284_v42 = vpop.f32.mrf.mxu1 }
 0x1cf   :  { %v305_v43 = vpack.c.bf16 %v287_v41, %v287_v41 }
 0x1d0   :  { %v634_v44 = vpop.f32.mrf.mxu1 }
 0x1d1   :  { %652 = vmatmul.mubr.bf16.vlgmr.msra.gmra.mxu0 %v305_v43 }
 0x291   :  { %v394_v48 = vpop.f32.mrf.mxu0 }
 0x292   :  { %v395_v49 = vadd.f32 %v552_v47, %v394_v48 }
 0x293   :  { %v653_v50 = vpop.f32.mrf.mxu0 }
 0x294   :  { %v400_v51 = vmax.f32 %v395_v49, 0.0 }
 0x295   :  { %v397_v52 = vpop.f32.mrf.mxu0 }
 0x296   :  { %v418_v53 = vpack.c.bf16 %v400_v51, %v400_v51 }
 0x297   :  { %v654_v54 = vpop.f32.mrf.mxu0 }
 0x298   :  { %672 = vmatmul.mubr.bf16.vlgmr.msra.gmra.mxu1 %v418_v53 }
 0x358   :  { %v507_v56 = vpop.f32.mrf.mxu1 }
 0x359   :  { %v508_v57 = vadd.f32 %v561_v55, %v507_v56 }
 0x35a   :  { %v673_v58 = vpop.f32.mrf.mxu1 }
 0x35b   :  { %v570_v59 = vmul.f32 -1.442695, %v508_v57 }
 0x35c   :  { %v510_v60 = vpop.f32.mrf.mxu1 }
 0x35d   :  { %712 = vpow2.f32 %v570_v59 }
 0x35e   :  { %v674_v61 = vpop.f32.mrf.mxu1 }
 0x36a   :  { %v713_v62 = vpop.eup %712 }
 0x36b   :  { %v516_v63 = vadd.f32 1.0, %v713_v62 }
 0x36d   :  { %714 = vrcp.f32 %v516_v63 }
 0x37a   :  { %v715_v0 = vpop.eup %714 }
 0x37b   :  { %519 = vst [vmem:[#allocation10] sm:$0xff] %v715_v0 }
 0x37c   :  { %807 = shalt.err (!%p804_p10)
}
 0x37d   :  { %529 = dma.vmem_to_hbm [thread:$0]  %s527_s13, 128, %s970_s9, [#allocation4]  }
 0x37e   :  { %822 = dma.done.wait [#allocation4], 128  }
 0x37f   :  { %823 = vsyncadd [#allocation4], 4294967168 }
 0x380   :  { %533 = vsyncpa [#allocation3], 1 }
 0x381   :  { %534 = vsyncpa [#allocation6], 1 }
 0x382   :  { %535 = vsyncpa [#allocation9], 1 }
 0x383   :  { %536 = vsyncpa [#allocation4], 1 }

</bundles_post_ra>
